<compile_context>
chip_gen: v6e
topology: v6e:2x2x1
jax: 0.10.0
libtpu: 0.0.40
codegen_flags: <defaults>
</compile_context>

<pallas_src>
import jax
import jax.numpy as jnp
from jax.experimental import pallas as pl
from jax.experimental.pallas import tpu as pltpu

LANES = 128        # vreg lane width
SUBLANES = 8       # f32 sublanes per vreg
MAX_TM = 8192      # rows per grid step (4 MiB f32/input/step; amortizes ~0.35us/step)
CHUNK = 64         # strip-mine rows per inner-loop step (stays register-resident)
VMEM_LIMIT = 48 * 1024 * 1024   # > v5e's 16 MiB default scoped limit, < v7x 64 MiB phys


def _tensorcores_per_device():
    """2 on dual-TensorCore devices (v4/v5p megacore, v7x); 1 on v5e/v6e."""
    try:
        kind = jax.devices()[0].device_kind.lower()
    except Exception:
        return 1
    if any(s in kind for s in ("lite", "v5e", "v6e", "v2", "v3")):
        return 1
    return 2


def _pick_chunk(tm):
    # Largest chunk <= CHUNK rows that divides tm; prefer multiples of 16 so
    # bf16 (sublane-packed) chunk slices stay tile-aligned.
    for ch in (64, 48, 32, 16, 8):
        if tm % ch == 0:
            return ch
    return tm  # unreachable: tm is always a multiple of 8


def _pick_unroll(n_chunks):
    # Enough unrolling for ILP / LLO scheduling visibility, bounded code size.
    if n_chunks <= 8:
        return n_chunks
    for u in (8, 4, 2):
        if n_chunks % u == 0:
            return u
    return 1


def _make_kernel(tm, ch, rows_valid, blocks_per_core, need_edge):
    n_chunks = tm // ch
    unroll = _pick_unroll(n_chunks)

    def kernel(x_ref, t_ref, out_ref):
        c = pl.program_id(0)
        i = pl.program_id(1)
        # int32 row index: fine for < 2^31 rows (< 2^38 elements).
        block_start = (c * blocks_per_core + i) * tm

        def load(j):
            j0 = pl.multiple_of(j * ch, ch)
            x = x_ref[pl.ds(j0, ch), :].astype(jnp.float32)   # logits
            t = t_ref[pl.ds(j0, ch), :].astype(jnp.float32)   # targets in [0, 1]
            return x, t

        def chunk_sums(x, t, valid=None):
            # Shared transcendental work between sigmoid and stable BCE:
            #   sigmoid(x) = where(x>=0, 1, e) / (1 + e),   e = exp(-|x|)
            #   -(t*log(p) + (1-t)*log(1-p)) == max(x,0) - x*t + log(1 + e)
            # (PyTorch's binary_cross_entropy clamps log at -100; differs only
            #  in extreme saturation.)
            e = jnp.exp(-jnp.abs(x))
            one_plus_e = 1.0 + e
            # EUP reciprocal + one Newton step: ~f32 accuracy, no VALU divide.
            inv = pl.reciprocal(one_plus_e, approx=True)
            inv = inv * (2.0 - one_plus_e * inv)
            p = jnp.where(x >= 0.0, 1.0, e) * inv             # sigmoid(x)
            bce = jnp.maximum(x, 0.0) - x * t + jnp.log(one_plus_e)
            if valid is not None:
                # Edge / clamped-duplicate blocks only: zero the summed
                # quantities exactly (stale VMEM rows, even NaN/Inf, drop out).
                p = jnp.where(valid, p, 0.0)
                t = jnp.where(valid, t, 0.0)
                bce = jnp.where(valid, bce, 0.0)

            def fold(v):   # (ch,128) -> (8,128) per-lane partials; pure VPU adds
                return jnp.sum(v.reshape(ch // SUBLANES, SUBLANES, LANES), axis=0)

            return fold(p * t), fold(p), fold(t), fold(bce)

        zeros4 = (jnp.zeros((SUBLANES, LANES), jnp.float32),) * 4

        def interior():
            def body(j, accs):
                x, t = load(j)
                d = chunk_sums(x, t)
                return tuple(a + v for a, v in zip(accs, d))
            return jax.lax.fori_loop(0, n_chunks, body, zeros4, unroll=unroll)

        if need_edge:
            def edge():
                row_iota = jax.lax.broadcasted_iota(jnp.int32, (ch, 1), 0)

                def body(j, accs):
                    x, t = load(j)
                    rows = row_iota + (block_start + j * ch)
                    d = chunk_sums(x, t, valid=rows < rows_valid)
                    return tuple(a + v for a, v in zip(accs, d))
                return jax.lax.fori_loop(0, n_chunks, body, zeros4)

            # Only the last real (ragged) block and clamped duplicate blocks pay
            # for masking; interior steps stay on the mask-free unrolled loop.
            is_interior = block_start + tm <= rows_valid
            accs = jax.lax.cond(is_interior, interior, edge)
        else:
            accs = interior()

        inter_acc, p_acc, t_acc, bce_acc = accs

        @pl.when(i == 0)
        def _():
            out_ref[...] = jnp.zeros_like(out_ref)

        out_ref[0, 0] += inter_acc   # sum(p * t) partials
        out_ref[0, 1] += p_acc       # sum(p) partials
        out_ref[0, 2] += t_acc       # sum(t) partials
        out_ref[0, 3] += bce_acc     # sum(bce) partials

    return kernel


def _partial_sums_pallas(xp, tp, rows, tm, nc, nbpc, need_edge):
    ch = _pick_chunk(tm)
    kernel = _make_kernel(tm, ch, rows, nbpc, need_edge)
    nb_real = pl.cdiv(rows, tm)

    def in_map(c, i):
        # Clamp so no DMA ever starts past the array; clamped duplicate blocks
        # are fully masked by the kernel's edge path.
        return (jnp.minimum(c * nbpc + i, nb_real - 1), 0)

    n_main = rows * LANES
    bytes_io = n_main * (xp.dtype.itemsize + tp.dtype.itemsize) \
        + nc * 4 * SUBLANES * LANES * 4

    return pl.pallas_call(
        kernel,
        out_shape=jax.ShapeDtypeStruct((nc, 4, SUBLANES, LANES), jnp.float32),
        grid=(nc, nbpc),
        in_specs=[
            pl.BlockSpec((tm, LANES), in_map),
            pl.BlockSpec((tm, LANES), in_map),
        ],
        out_specs=pl.BlockSpec((1, 4, SUBLANES, LANES), lambda c, i: (c, 0, 0, 0)),
        compiler_params=pltpu.CompilerParams(
            dimension_semantics=("parallel", "arbitrary"),
            vmem_limit_bytes=VMEM_LIMIT,
        ),
        cost_estimate=pl.CostEstimate(
            flops=18 * n_main,
            transcendentals=3 * n_main,
            bytes_accessed=bytes_io,
        ),
    )(xp, tp)


def dice_bce_loss(inputs, targets, smooth=1.0, *, max_rows_per_block=MAX_TM):
    """JAX/Pallas equivalent of DiceBCELoss.forward(inputs, targets, smooth)."""
    x = jnp.reshape(inputs, (-1,))
    t = jnp.reshape(targets, (-1,))
    if not jnp.issubdtype(x.dtype, jnp.floating):
        x = x.astype(jnp.float32)
    if not jnp.issubdtype(t.dtype, jnp.floating):
        # bool/int targets are exact in bf16 ({0,1}) and halve streamed bytes on
        # the HBM-bound chips (v5e/v6e); the kernel upcasts to f32.
        t = t.astype(jnp.bfloat16)
    n = x.shape[0]
    # TODO(synk): n == 0 yields NaN BCE (division by zero), same as PyTorch; not guarded.

    tile_elems = SUBLANES * LANES            # 1024
    n_main = (n // tile_elems) * tile_elems  # kernel-streamed, 1024-aligned prefix
    n_tail = n - n_main

    # Ragged tail (< 1024 elements): reduce in plain XLA instead of jnp.pad-ing
    # (and thereby copying) both full inputs.
    if n_tail:
        xt = x[n_main:].astype(jnp.float32)
        tt = t[n_main:].astype(jnp.float32)
        et = jnp.exp(-jnp.abs(xt))
        pt = jnp.where(xt >= 0.0, 1.0, et) / (1.0 + et)
        bt = jnp.maximum(xt, 0.0) - xt * tt + jnp.log1p(et)
        totals = jnp.stack([jnp.sum(pt * tt), jnp.sum(pt), jnp.sum(tt), jnp.sum(bt)])
    else:
        totals = jnp.zeros((4,), jnp.float32)

    if n_main:
        rows = n_main // LANES                                    # multiple of 8
        xp = (x[:n_main] if n_tail else x).reshape(rows, LANES)   # free reshape when aligned
        tp = (t[:n_main] if n_tail else t).reshape(rows, LANES)

        mrpb = max(8, (max_rows_per_block // 8) * 8)
        tm = min(mrpb, rows)                                      # multiple of 8, or == rows
        nb_real = pl.cdiv(rows, tm)                               # real row-blocks
        nc = _tensorcores_per_device()
        nc = nc if nb_real >= nc else 1
        nbpc = pl.cdiv(nb_real, nc)                               # blocks per core
        need_edge = (nc * nbpc * tm != rows)

        sums = _partial_sums_pallas(xp, tp, rows, tm, nc, nbpc, need_edge)
        totals = totals + jnp.sum(sums, axis=(0, 2, 3))           # tiny (4,) reduction in XLA

    intersection, p_sum, t_sum, bce_sum = totals[0], totals[1], totals[2], totals[3]
    dice_loss = 1.0 - (2.0 * intersection + smooth) / (p_sum + t_sum + smooth)
    bce = bce_sum / jnp.float32(n)
    return bce + dice_loss


if __name__ == "__main__":
    key = jax.random.PRNGKey(0)
    k1, k2, k3, k4, k5, k6 = jax.random.split(key, 6)

    def reference(inputs, targets, smooth=1.0):
        # Pure-JAX mirror of the PyTorch forward (sigmoid + flattened Dice + mean BCE).
        p = jax.nn.sigmoid(inputs.astype(jnp.float32)).reshape(-1)
        t = targets.astype(jnp.float32).reshape(-1)
        inter = jnp.sum(p * t)
        dice = 1.0 - (2.0 * inter + smooth) / (jnp.sum(p) + jnp.sum(t) + smooth)
        bce = jnp.mean(-(t * jnp.log(p) + (1.0 - t) * jnp.log(1.0 - p)))
        return bce + dice

    # 1) NCHW logits + boolean targets (streamed as bf16), 1024-aligned size.
    x1 = jax.random.normal(k1, (2, 4, 16, 16), dtype=jnp.float32)
    t1 = jax.random.uniform(k2, (2, 4, 16, 16)) > 0.5
    loss1 = jax.jit(dice_bce_loss)(x1, t1)
    jax.block_until_ready(loss1)
    r1 = reference(x1, t1)
    assert jnp.allclose(loss1, r1, atol=1e-5, rtol=1e-5), (loss1, r1)

    # 2) Ragged size + tiny row blocks: exercises multi-step grid accumulation,
    #    the gated edge-masking path (partial last block + clamped duplicate
    #    block) and the XLA tail reduction.
    x2 = jax.random.normal(k3, (60, 97), dtype=jnp.float32)        # 5820 elements
    t2 = (jax.random.uniform(k4, (60, 97)) > 0.5).astype(jnp.float32)
    loss2 = jax.jit(lambda a, b: dice_bce_loss(a, b, max_rows_per_block=16))(x2, t2)
    jax.block_until_ready(loss2)
    r2 = reference(x2, t2)
    assert jnp.allclose(loss2, r2, atol=5e-5, rtol=5e-5), (loss2, r2)

    # 3) Ragged size with a multi-chunk strip-mined inner loop (64-row chunks),
    #    bf16 targets and an edge block.
    x3 = jax.random.normal(k5, (270, 130), dtype=jnp.float32)      # 35100 elements
    t3 = jax.random.uniform(k6, (270, 130)) > 0.5
    loss3 = jax.jit(lambda a, b: dice_bce_loss(a, b, max_rows_per_block=128))(x3, t3)
    jax.block_until_ready(loss3)
    r3 = reference(x3, t3)
    assert jnp.allclose(loss3, r3, atol=5e-5, rtol=5e-5), (loss3, r3)

    print("KERNEL_OK")
</pallas_src>

<mosaic_0001>
module attributes {stable_mosaic.version = 11 : i64} {
  func.func @kernel(%arg0: i32, %arg1: i32, %arg2: memref<16x128xf32, #tpu.memory_space<vmem>>, %arg3: memref<16x128xbf16, #tpu.memory_space<vmem>>, %arg4: memref<1x4x8x128xf32, #tpu.memory_space<vmem>>) attributes {dimension_semantics = [#tpu.dimension_semantics<parallel>, #tpu.dimension_semantics<arbitrary>], iteration_bounds = array<i64: 1, 1>, scalar_prefetch = 0 : i64, scratch_operands = 0 : i64, tpu.core_type = #tpu.core_type<tc>, window_params = [{transform_indices = @transform_0, window_bounds = array<i64: 16, 128>}, {transform_indices = @transform_1, window_bounds = array<i64: 16, 128>}, {transform_indices = @transform_2, window_bounds = array<i64: 1, 4, 8, 128>}]} {
    %cst = arith.constant 0.000000e+00 : f32
    %0 = vector.broadcast %cst : f32 to vector<8x128xf32>
    %c0_i32 = arith.constant 0 : i32
    %c16_i32 = arith.constant 16 : i32
    %1 = arith.muli %c0_i32, %c16_i32 : i32
    %2 = tpu.assume_multiple %1, 16 : i32
    %3 = arith.index_cast %2 : i32 to index
    %c0 = arith.constant 0 : index
    %4 = vector.load %arg2[%3, %c0] : memref<16x128xf32, #tpu.memory_space<vmem>>, vector<16x128xf32>
    %5 = arith.index_cast %2 : i32 to index
    %c0_0 = arith.constant 0 : index
    %6 = vector.load %arg3[%5, %c0_0] : memref<16x128xbf16, #tpu.memory_space<vmem>>, vector<16x128xbf16>
    %7 = arith.extf %6 : vector<16x128xbf16> to vector<16x128xf32>
    %8 = math.absf %4 : vector<16x128xf32>
    %cst_1 = arith.constant 0.000000e+00 : f32
    %9 = vector.broadcast %cst_1 : f32 to vector<16x128xf32>
    %10 = arith.subf %9, %8 : vector<16x128xf32>
    %11 = math.exp %10 : vector<16x128xf32>
    %cst_2 = arith.constant 1.000000e+00 : f32
    %12 = vector.broadcast %cst_2 : f32 to vector<16x128xf32>
    %13 = arith.addf %12, %11 : vector<16x128xf32>
    %14 = tpu.reciprocal %13 {approx = true} : vector<16x128xf32> -> vector<16x128xf32>
    %15 = arith.mulf %13, %14 : vector<16x128xf32>
    %cst_3 = arith.constant 2.000000e+00 : f32
    %16 = vector.broadcast %cst_3 : f32 to vector<16x128xf32>
    %17 = arith.subf %16, %15 : vector<16x128xf32>
    %18 = arith.mulf %14, %17 : vector<16x128xf32>
    %cst_4 = arith.constant 0.000000e+00 : f32
    %19 = vector.broadcast %cst_4 : f32 to vector<16x128xf32>
    %20 = arith.cmpf oge, %4, %19 : vector<16x128xf32>
    %cst_5 = arith.constant 1.000000e+00 : f32
    %21 = vector.broadcast %cst_5 : f32 to vector<16x128xf32>
    %22 = arith.select %20, %21, %11 : vector<16x128xi1>, vector<16x128xf32>
    %23 = arith.mulf %22, %18 : vector<16x128xf32>
    %cst_6 = arith.constant 0.000000e+00 : f32
    %24 = vector.broadcast %cst_6 : f32 to vector<16x128xf32>
    %25 = arith.maximumf %4, %24 : vector<16x128xf32>
    %26 = arith.mulf %4, %7 : vector<16x128xf32>
    %27 = arith.subf %25, %26 : vector<16x128xf32>
    %28 = math.log %13 : vector<16x128xf32>
    %29 = arith.addf %27, %28 : vector<16x128xf32>
    %30 = arith.mulf %23, %7 : vector<16x128xf32>
    %31 = vector.shape_cast %30 : vector<16x128xf32> to vector<2x8x128xf32>
    %cst_7 = arith.constant dense<0.000000e+00> : vector<8x128xf32>
    %32 = vector.multi_reduction <add>, %31, %cst_7 [0] : vector<2x8x128xf32> to vector<8x128xf32>
    %33 = vector.shape_cast %23 : vector<16x128xf32> to vector<2x8x128xf32>
    %cst_8 = arith.constant dense<0.000000e+00> : vector<8x128xf32>
    %34 = vector.multi_reduction <add>, %33, %cst_8 [0] : vector<2x8x128xf32> to vector<8x128xf32>
    %35 = vector.shape_cast %7 : vector<16x128xf32> to vector<2x8x128xf32>
    %cst_9 = arith.constant dense<0.000000e+00> : vector<8x128xf32>
    %36 = vector.multi_reduction <add>, %35, %cst_9 [0] : vector<2x8x128xf32> to vector<8x128xf32>
    %37 = vector.shape_cast %29 : vector<16x128xf32> to vector<2x8x128xf32>
    %cst_10 = arith.constant dense<0.000000e+00> : vector<8x128xf32>
    %38 = vector.multi_reduction <add>, %37, %cst_10 [0] : vector<2x8x128xf32> to vector<8x128xf32>
    %39 = arith.addf %0, %32 : vector<8x128xf32>
    %40 = arith.addf %0, %34 : vector<8x128xf32>
    %41 = arith.addf %0, %36 : vector<8x128xf32>
    %42 = arith.addf %0, %38 : vector<8x128xf32>
    %c1_i32 = arith.constant 1 : i32
    %c0_i32_11 = arith.constant 0 : i32
    %43 = arith.cmpi eq, %arg1, %c0_i32_11 : i32
    %44 = arith.extui %43 : i1 to i32
    %c0_i32_12 = arith.constant 0 : i32
    %45 = arith.cmpi ne, %44, %c0_i32_12 : i32
    scf.if %45 {
      %cst_42 = arith.constant 0.000000e+00 : f32
      %70 = vector.broadcast %cst_42 : f32 to vector<1x4x8x128xf32>
      %c0_43 = arith.constant 0 : index
      %c0_44 = arith.constant 0 : index
      %c0_45 = arith.constant 0 : index
      %c0_46 = arith.constant 0 : index
      %71 = vector.load %arg4[%c0_43, %c0_44, %c0_45, %c0_46] : memref<1x4x8x128xf32, #tpu.memory_space<vmem>>, vector<1x4x8x128xf32>
      tpu.vector_store %arg4[%c0_43, %c0_44, %c0_45, %c0_46], %70 {strides = array<i32>} : memref<1x4x8x128xf32, #tpu.memory_space<vmem>>, vector<1x4x8x128xf32>,
    } else {
    }
    %c0_13 = arith.constant 0 : index
    %c0_14 = arith.constant 0 : index
    %c0_15 = arith.constant 0 : index
    %c0_16 = arith.constant 0 : index
    %46 = vector.load %arg4[%c0_13, %c0_14, %c0_15, %c0_16] : memref<1x4x8x128xf32, #tpu.memory_space<vmem>>, vector<1x1x8x128xf32>
    %47 = vector.shape_cast %46 : vector<1x1x8x128xf32> to vector<8x128xf32>
    %48 = arith.addf %47, %39 : vector<8x128xf32>
    %c0_17 = arith.constant 0 : index
    %c0_18 = arith.constant 0 : index
    %c0_19 = arith.constant 0 : index
    %c0_20 = arith.constant 0 : index
    %49 = vector.load %arg4[%c0_17, %c0_18, %c0_19, %c0_20] : memref<1x4x8x128xf32, #tpu.memory_space<vmem>>, vector<1x1x8x128xf32>
    %50 = vector.shape_cast %49 : vector<1x1x8x128xf32> to vector<8x128xf32>
    %51 = vector.shape_cast %48 : vector<8x128xf32> to vector<1x1x8x128xf32>
    tpu.vector_store %arg4[%c0_17, %c0_18, %c0_19, %c0_20], %51 {strides = array<i32>} : memref<1x4x8x128xf32, #tpu.memory_space<vmem>>, vector<1x1x8x128xf32>,
    %c0_21 = arith.constant 0 : index
    %c1 = arith.constant 1 : index
    %c0_22 = arith.constant 0 : index
    %c0_23 = arith.constant 0 : index
    %52 = vector.load %arg4[%c0_21, %c1, %c0_22, %c0_23] : memref<1x4x8x128xf32, #tpu.memory_space<vmem>>, vector<1x1x8x128xf32>
    %53 = vector.shape_cast %52 : vector<1x1x8x128xf32> to vector<8x128xf32>
    %54 = arith.addf %53, %40 : vector<8x128xf32>
    %c0_24 = arith.constant 0 : index
    %c1_25 = arith.constant 1 : index
    %c0_26 = arith.constant 0 : index
    %c0_27 = arith.constant 0 : index
    %55 = vector.load %arg4[%c0_24, %c1_25, %c0_26, %c0_27] : memref<1x4x8x128xf32, #tpu.memory_space<vmem>>, vector<1x1x8x128xf32>
    %56 = vector.shape_cast %55 : vector<1x1x8x128xf32> to vector<8x128xf32>
    %57 = vector.shape_cast %54 : vector<8x128xf32> to vector<1x1x8x128xf32>
    tpu.vector_store %arg4[%c0_24, %c1_25, %c0_26, %c0_27], %57 {strides = array<i32>} : memref<1x4x8x128xf32, #tpu.memory_space<vmem>>, vector<1x1x8x128xf32>,
    %c0_28 = arith.constant 0 : index
    %c2 = arith.constant 2 : index
    %c0_29 = arith.constant 0 : index
    %c0_30 = arith.constant 0 : index
    %58 = vector.load %arg4[%c0_28, %c2, %c0_29, %c0_30] : memref<1x4x8x128xf32, #tpu.memory_space<vmem>>, vector<1x1x8x128xf32>
    %59 = vector.shape_cast %58 : vector<1x1x8x128xf32> to vector<8x128xf32>
    %60 = arith.addf %59, %41 : vector<8x128xf32>
    %c0_31 = arith.constant 0 : index
    %c2_32 = arith.constant 2 : index
    %c0_33 = arith.constant 0 : index
    %c0_34 = arith.constant 0 : index
    %61 = vector.load %arg4[%c0_31, %c2_32, %c0_33, %c0_34] : memref<1x4x8x128xf32, #tpu.memory_space<vmem>>, vector<1x1x8x128xf32>
    %62 = vector.shape_cast %61 : vector<1x1x8x128xf32> to vector<8x128xf32>
    %63 = vector.shape_cast %60 : vector<8x128xf32> to vector<1x1x8x128xf32>
    tpu.vector_store %arg4[%c0_31, %c2_32, %c0_33, %c0_34], %63 {strides = array<i32>} : memref<1x4x8x128xf32, #tpu.memory_space<vmem>>, vector<1x1x8x128xf32>,
    %c0_35 = arith.constant 0 : index
    %c3 = arith.constant 3 : index
    %c0_36 = arith.constant 0 : index
    %c0_37 = arith.constant 0 : index
    %64 = vector.load %arg4[%c0_35, %c3, %c0_36, %c0_37] : memref<1x4x8x128xf32, #tpu.memory_space<vmem>>, vector<1x1x8x128xf32>
    %65 = vector.shape_cast %64 : vector<1x1x8x128xf32> to vector<8x128xf32>
    %66 = arith.addf %65, %42 : vector<8x128xf32>
    %c0_38 = arith.constant 0 : index
    %c3_39 = arith.constant 3 : index
    %c0_40 = arith.constant 0 : index
    %c0_41 = arith.constant 0 : index
    %67 = vector.load %arg4[%c0_38, %c3_39, %c0_40, %c0_41] : memref<1x4x8x128xf32, #tpu.memory_space<vmem>>, vector<1x1x8x128xf32>
    %68 = vector.shape_cast %67 : vector<1x1x8x128xf32> to vector<8x128xf32>
    %69 = vector.shape_cast %66 : vector<8x128xf32> to vector<1x1x8x128xf32>
    tpu.vector_store %arg4[%c0_38, %c3_39, %c0_40, %c0_41], %69 {strides = array<i32>} : memref<1x4x8x128xf32, #tpu.memory_space<vmem>>, vector<1x1x8x128xf32>,
    return
  }
  func.func @transform_0(%arg0: i32, %arg1: i32) -> (i32, i32) {
    %c1_i32 = arith.constant 1 : i32
    %0 = arith.muli %arg0, %c1_i32 : i32
    %1 = arith.addi %0, %arg1 : i32
    %c0_i32 = arith.constant 0 : i32
    %2 = arith.minsi %1, %c0_i32 : i32
    %c0_i32_0 = arith.constant 0 : i32
    %c0_i32_1 = arith.constant 0 : i32
    return %2, %c0_i32_0 : i32, i32
  }
  func.func @transform_1(%arg0: i32, %arg1: i32) -> (i32, i32) {
    %c1_i32 = arith.constant 1 : i32
    %0 = arith.muli %arg0, %c1_i32 : i32
    %1 = arith.addi %0, %arg1 : i32
    %c0_i32 = arith.constant 0 : i32
    %2 = arith.minsi %1, %c0_i32 : i32
    %c0_i32_0 = arith.constant 0 : i32
    %c0_i32_1 = arith.constant 0 : i32
    return %2, %c0_i32_0 : i32, i32
  }
  func.func @transform_2(%arg0: i32, %arg1: i32) -> (i32, i32, i32, i32) {
    %c0_i32 = arith.constant 0 : i32
    %c0_i32_0 = arith.constant 0 : i32
    %c0_i32_1 = arith.constant 0 : i32
    %c0_i32_2 = arith.constant 0 : i32
    return %arg0, %c0_i32, %c0_i32_0, %c0_i32_1 : i32, i32, i32, i32
  }
}

</mosaic_0001>

<bundles_post_ra>
// kernel: dice_bce_loss.1
= control target key start
LH: loop header
LB: loop body
LE: loop exit
PB: predicated region body
PF: predicated region fallthrough
CT: control target
= control target key end

     0   :  { %s225_s0 = inlined_call_operand.vmem [shape: f32[16,128], index: 0, kind: input, shape index: {}]   ;;  %s226_s1 = inlined_call_operand.vmem [shape: bf16[16,128], index: 1, kind: input, shape index: {}]   ;;  %s227_s2 = inlined_call_operand.vmem [shape: f32[1,4,8,128], index: 2, kind: output, shape index: {}]  }
   0x1   :  { %v75_v0 = vld [vmem:[%s225_s0] sm:$0xff]  ;;  %v76_v1 = vld [vmem:[%s225_s0 + $0x8] sm:$0xff] }
   0x2   :  { %v173_v2 = vld [vmem:[%s226_s1] sm:$0xff]   ;;  %v81_v5 = vand.u32 2147483647, %v75_v0  ;;  %v82_v6 = vand.u32 2147483647, %v76_v1  ;;  %v105_v16 = vmax.f32 %v75_v0, 0.0 }
   0x3   :  { %v174_v3 = vunpack.c.l.bf16 %v173_v2  ;;  %v175_v4 = vunpack.c.h.bf16 %v173_v2  ;;  %v106_v18 = vmax.f32 %v76_v1, 0.0  ;;  %vm99_vm0 = vcmp.ge.f32.partialorder %v75_v0, 0.0 }
   0x4   :  { %v83_v7 = vsub.f32 0.0, %v81_v5  ;;  %v84_v8 = vsub.f32 0.0, %v82_v6  ;;  %vm100_vm1 = vcmp.ge.f32.partialorder %v76_v1, 0.0 }
   0x5   :  { %v121_v9 = vadd.f32 %v175_v4, %v174_v3  ;;  %v107_v17 = vmul.f32 %v174_v3, %v75_v0  ;;  %v108_v19 = vmul.f32 %v175_v4, %v76_v1 }
   0x6   :  { %v85_v10 = vmul.f32 1.442695, %v83_v7  ;;  %v87_v11 = vmul.f32 1.442695, %v84_v8 }
   0x7   :  { %169 = vst [vmem:[%s227_s2 + $0x10] sm:$0xff] %v121_v9  ;;  %v109_v23 = vsub.f32 %v105_v16, %v107_v17  ;;  %v110_v26 = vsub.f32 %v106_v18, %v108_v19 }
   0x8   :  { %177 = vpow2.f32 %v85_v10 }
   0x9   :  { %179 = vpow2.f32 %v87_v11 }
  0x15   :  { %v178_v12 = vpop.eup %177 }
  0x16   :  { %v180_v13 = vpop.eup %179  ;;  %v89_v14 = vadd.f32 1.0, %v178_v12  ;;  %v101_v31 = vsel %vm99_vm0, 1.0, %v178_v12 }
  0x17   :  { %v90_v15 = vadd.f32 1.0, %v180_v13  ;;  %v102_v34 = vsel %vm100_vm1, 1.0, %v180_v13 }
  0x18   :  { %181 = vrcp.f32 %v89_v14 }
  0x19   :  { %183 = vrcp.f32 %v90_v15 }
  0x1a   :  { %185 = vlog2.f32 %v89_v14 }
  0x1b   :  { %187 = vlog2.f32 %v90_v15 }
  0x25   :  { %v182_v20 = vpop.eup %181 }
  0x26   :  { %v184_v21 = vpop.eup %183  ;;  %v93_v22 = vmul.f32 %v182_v20, %v89_v14 }
  0x27   :  { %v186_v24 = vpop.eup %185  ;;  %v94_v25 = vmul.f32 %v184_v21, %v90_v15 }
  0x28   :  { %v188_v27 = vpop.eup %187  ;;  %v95_v28 = vsub.f32 2.0, %v93_v22  ;;  %v112_v29 = vmul.f32 0.6931472, %v186_v24 }
  0x29   :  { %v96_v30 = vsub.f32 2.0, %v94_v25  ;;  %v114_v32 = vmul.f32 0.6931472, %v188_v27 }
  0x2a   :  { %v97_v33 = vmul.f32 %v182_v20, %v95_v28  ;;  %v115_v35 = vadd.f32 %v112_v29, %v109_v23 }
  0x2b   :  { %v98_v36 = vmul.f32 %v184_v21, %v96_v30  ;;  %v116_v37 = vadd.f32 %v114_v32, %v110_v26 }
  0x2c   :  { %v103_v38 = vmul.f32 %v101_v31, %v97_v33 }
  0x2d   :  { %v104_v39 = vmul.f32 %v102_v34, %v98_v36  ;;  %v122_v40 = vadd.f32 %v116_v37, %v115_v35 }
  0x2e   :  { %v117_v41 = vmul.f32 %v174_v3, %v103_v38 }
  0x2f   :  { %v118_v42 = vmul.f32 %v175_v4, %v104_v39  ;;  %v120_v43 = vadd.f32 %v104_v39, %v103_v38  ;;  %171 = vst [vmem:[%s227_s2 + $0x18] sm:$0xff] %v122_v40 }
  0x31   :  { %v119_v44 = vadd.f32 %v118_v42, %v117_v41  ;;  %167 = vst [vmem:[%s227_s2 + $0x8] sm:$0xff] %v120_v43 }
  0x33   :  { %137 = vst [vmem:[%s227_s2] sm:$0xff] %v119_v44 }

</bundles_post_ra>
